<compile_context>
chip_gen: v7x
topology: tpu7x:2x2x1
jax: 0.10.0
libtpu: 0.0.40
codegen_flags: <defaults>
</compile_context>

<pallas_src>
import functools

import jax
import jax.numpy as jnp
from jax.experimental import pallas as pl
from jax.experimental.pallas import tpu as pltpu

H1 = 256   # first encoder hidden width  (fixed by the module)
H2 = 128   # second encoder hidden width (fixed by the module)


def _round_up(n, m):
    return ((n + m - 1) // m) * m


def _pad_to(a, shape):
    pads = [(0, s - d) for d, s in zip(a.shape, shape)]
    if any(p[1] for p in pads):
        return jnp.pad(a, pads)
    return a


# ----------------------------------------------------------------------------
# one-time weight preparation (hoisted out of the per-call path)
# ----------------------------------------------------------------------------
def prepare_params(params, compute_dtype=jnp.bfloat16):
    """Fold the decoder, fuse latent+decoder projections, pad to lane width.

    Returns (w1, b1, w2, b2, w_out, b_out) where
      w_out = [ w3 | w3 @ w4 ]  padded to (H2, Lp + Dp)   (compute_dtype)
      b_out = [ b3 | b3 @ w4 + b4 ] padded to (1, Lp + Dp)  (f32)
    NOTE: the fold (recon = h2 @ (w3 @ w4) + ...) is mathematically equivalent
    but changes rounding order; with bf16-stored weights w34 is re-quantized.
    Verified within loose tolerance at demo sizes; check for production sizes.
    """
    w1, b1, w2, b2, w3, b3, w4, b4 = params
    D = w1.shape[0]
    L = w3.shape[1]
    Lp = _round_up(max(L, 1), 128)
    Dp = _round_up(max(D, 1), 128)

    f32 = jnp.float32
    b1 = b1.astype(f32).reshape(1, -1)
    b2 = b2.astype(f32).reshape(1, -1)
    b3 = b3.astype(f32).reshape(1, -1)
    b4 = b4.astype(f32).reshape(1, -1)

    # decoder fold: recon = (h2 @ w3 + b3) @ w4 + b4 == h2 @ w34 + b34
    w34 = jnp.dot(w3.astype(f32), w4.astype(f32))
    b34 = jnp.dot(b3, w4.astype(f32)) + b4

    # fuse latent + decoder into one lane-dense output projection
    w_out = jnp.concatenate(
        [_pad_to(w3.astype(f32), (H2, Lp)), _pad_to(w34, (H2, Dp))], axis=1)
    b_out = jnp.concatenate(
        [_pad_to(b3, (1, Lp)), _pad_to(b34, (1, Dp))], axis=1)

    return (w1.astype(compute_dtype), b1,
            w2.astype(compute_dtype), b2,
            w_out.astype(compute_dtype), b_out)


# ----------------------------------------------------------------------------
# kernel: fused 4-layer MLP forward for one batch tile
# ----------------------------------------------------------------------------
def _ae_kernel(x_ref, w1_ref, b1_ref, w2_ref, b2_ref, wout_ref, bout_ref,
               out_ref):
    f32 = jnp.float32
    cdt = w1_ref.dtype                       # MXU operand dtype (bf16 default)

    x = x_ref[...].astype(cdt)

    h1 = jnp.dot(x, w1_ref[...], preferred_element_type=f32)
    h1 = jnp.maximum(h1 + b1_ref[...], 0.0)          # f32 bias + ReLU (VPU)

    h2 = jnp.dot(h1.astype(cdt), w2_ref[...], preferred_element_type=f32)
    h2 = jnp.maximum(h2 + b2_ref[...], 0.0)

    # single fused (H2, Lp+Dp) matmul: [ z | recon ] in one lane-dense slab
    out = jnp.dot(h2.astype(cdt), wout_ref[...], preferred_element_type=f32)
    out_ref[...] = (out + bout_ref[...]).astype(out_ref.dtype)


# ----------------------------------------------------------------------------
# wrapper
# ----------------------------------------------------------------------------
@functools.partial(jax.jit, static_argnames=("latent_size", "batch_tile"))
def autoencoder_forward(x, weights, *, latent_size, batch_tile=1024):
    """Returns (x_recon, z), matching Autoencoder.forward semantics."""
    w1, b1, w2, b2, w_out, b_out = weights
    B, D = x.shape
    L = int(latent_size)
    assert w1.shape == (D, H1) and w_out.shape[0] == H2

    Dp = _round_up(max(D, 1), 128)
    NO = w_out.shape[1]                      # Lp + Dp (lane-dense output width)
    Lp = NO - Dp
    assert Lp >= L

    in_bytes = jnp.dtype(x.dtype).itemsize
    w_bytes = jnp.dtype(w1.dtype).itemsize
    out_dtype = x.dtype
    out_bytes = jnp.dtype(out_dtype).itemsize

    param_bytes = (w_bytes * (D * H1 + H1 * H2 + H2 * NO)
                   + 4 * (H1 + H2 + NO))

    # ---- batch tile selection ----------------------------------------------
    # balanced tiles (minimal padding), >= 2 grid steps when possible so the
    # "parallel" batch axis shards across v7x's two TensorCores, and the tile
    # shrinks if the per-step VMEM footprint would exceed the budget.
    def footprint(t):
        io = 2 * t * (D * in_bytes + NO * out_bytes)   # double-buffered x / out
        live = 4 * t * (H1 + H2 + NO)                  # f32 intermediates
        return param_bytes + io + live

    budget = 40 * 1024 * 1024                          # safe under v7x 64 MiB VMEM
    min_steps = 2 if B > 8 else 1
    nsteps = max(pl.cdiv(B, batch_tile), min_steps)
    tile = _round_up(pl.cdiv(B, nsteps), 8)
    while tile > 8 and footprint(tile) > budget:
        tile = _round_up(tile // 2, 8)
    # TODO(synk): for very large input_size, add feature (D) tiling with an
    # f32 accumulator scratch + "arbitrary" reduction axis instead of only
    # shrinking the batch tile.
    nsteps = max(pl.cdiv(B, tile), min_steps)
    tile = _round_up(pl.cdiv(B, nsteps), 8)            # re-balance (never grows)
    Bp = nsteps * tile

    xp = _pad_to(x, (Bp, D))                           # batch padding only

    vmem_limit = int(min(48 * 1024 * 1024, footprint(tile) + (4 << 20)))

    flops = 2 * Bp * (D * H1 + H1 * H2 + H2 * NO)
    bytes_accessed = in_bytes * Bp * D + out_bytes * Bp * NO + param_bytes

    full2d = lambda shape: pl.BlockSpec(shape, lambda i: (0, 0))

    out_p = pl.pallas_call(
        _ae_kernel,
        out_shape=jax.ShapeDtypeStruct((Bp, NO), out_dtype),
        grid_spec=pl.GridSpec(
            grid=(nsteps,),
            in_specs=[
                # x tile: lane dim left at D (== full array dim), not padded
                pl.BlockSpec((tile, D), lambda i: (i, 0)),
                full2d((D, H1)), full2d((1, H1)),
                full2d((H1, H2)), full2d((1, H2)),
                full2d((H2, NO)), full2d((1, NO)),
            ],
            out_specs=pl.BlockSpec((tile, NO), lambda i: (i, 0)),
        ),
        compiler_params=pltpu.CompilerParams(
            dimension_semantics=("parallel",),
            vmem_limit_bytes=vmem_limit,
        ),
        cost_estimate=pl.CostEstimate(
            flops=int(flops), transcendentals=0,
            bytes_accessed=int(bytes_accessed)),
    )(xp, w1, b1, w2, b2, w_out, b_out)

    z = out_p[:B, :L]
    recon = out_p[:B, Lp:Lp + D]
    return recon, z


# ----------------------------------------------------------------------------
# init / reference / demo
# ----------------------------------------------------------------------------
def init_params(key, input_size, latent_size, dtype=jnp.float32):
    """Deterministic init mimicking torch.nn.Linear default U[-1/sqrt(fan_in), 1/sqrt(fan_in)]."""
    dims = [(input_size, H1), (H1, H2), (H2, latent_size), (latent_size, input_size)]
    params = []
    for (fan_in, fan_out) in dims:
        key, kw, kb = jax.random.split(key, 3)
        bound = 1.0 / jnp.sqrt(jnp.float32(fan_in))
        w = jax.random.uniform(kw, (fan_in, fan_out), dtype, -bound, bound)
        b = jax.random.uniform(kb, (1, fan_out), dtype, -bound, bound)
        params += [w, b]
    return tuple(params)


def _reference_forward(x, params):
    """Pure-JAX f32 reference for correctness check."""
    w1, b1, w2, b2, w3, b3, w4, b4 = params
    h1 = jnp.maximum(x @ w1 + b1, 0.0)
    h2 = jnp.maximum(h1 @ w2 + b2, 0.0)
    z = h2 @ w3 + b3
    recon = z @ w4 + b4
    return recon, z


if __name__ == "__main__":
    key = jax.random.PRNGKey(0)
    batch, input_size, latent_size = 16, 32, 16

    kx, kp = jax.random.split(key)
    x = jax.random.normal(kx, (batch, input_size), jnp.float32)
    params = init_params(kp, input_size, latent_size)
    recon_ref, z_ref = _reference_forward(x, params)

    # --- bf16-operand path (default, MXU-native rate) ---
    weights_bf16 = prepare_params(params, compute_dtype=jnp.bfloat16)
    recon, z = autoencoder_forward(x, weights_bf16, latent_size=latent_size)
    recon, z = jax.block_until_ready((recon, z))

    assert recon.shape == (batch, input_size) and z.shape == (batch, latent_size)
    assert jnp.allclose(z, z_ref, atol=5e-2, rtol=5e-2)
    assert jnp.allclose(recon, recon_ref, atol=5e-2, rtol=5e-2)

    # --- f32-operand fallback path (tight check of kernel structure) ---
    weights_f32 = prepare_params(params, compute_dtype=jnp.float32)
    recon32, z32 = autoencoder_forward(x, weights_f32, latent_size=latent_size)
    recon32, z32 = jax.block_until_ready((recon32, z32))

    assert jnp.allclose(z32, z_ref, atol=1e-4, rtol=1e-4)
    assert jnp.allclose(recon32, recon_ref, atol=1e-4, rtol=1e-4)

    print("KERNEL_OK")
</pallas_src>

<mosaic_0001>
module attributes {stable_mosaic.version = 11 : i64} {
  func.func @_ae_kernel(%arg0: i32, %arg1: memref<8x32xf32, #tpu.memory_space<vmem>>, %arg2: memref<32x256xbf16, #tpu.memory_space<vmem>>, %arg3: memref<1x256xf32, #tpu.memory_space<vmem>>, %arg4: memref<256x128xbf16, #tpu.memory_space<vmem>>, %arg5: memref<1x128xf32, #tpu.memory_space<vmem>>, %arg6: memref<128x256xbf16, #tpu.memory_space<vmem>>, %arg7: memref<1x256xf32, #tpu.memory_space<vmem>>, %arg8: memref<8x256xf32, #tpu.memory_space<vmem>>) attributes {dimension_semantics = [#tpu.dimension_semantics<parallel>], iteration_bounds = array<i64: 2>, scalar_prefetch = 0 : i64, scratch_operands = 0 : i64, tpu.core_type = #tpu.core_type<tc>, window_params = [{transform_indices = @transform_0, window_bounds = array<i64: 8, 32>}, {pipeline_mode = #tpu.pipeline_mode<synchronous>, transform_indices = @transform_1, window_bounds = array<i64: 32, 256>}, {pipeline_mode = #tpu.pipeline_mode<synchronous>, transform_indices = @transform_2, window_bounds = array<i64: 1, 256>}, {pipeline_mode = #tpu.pipeline_mode<synchronous>, transform_indices = @transform_3, window_bounds = array<i64: 256, 128>}, {pipeline_mode = #tpu.pipeline_mode<synchronous>, transform_indices = @transform_4, window_bounds = array<i64: 1, 128>}, {pipeline_mode = #tpu.pipeline_mode<synchronous>, transform_indices = @transform_5, window_bounds = array<i64: 128, 256>}, {pipeline_mode = #tpu.pipeline_mode<synchronous>, transform_indices = @transform_6, window_bounds = array<i64: 1, 256>}, {transform_indices = @transform_7, window_bounds = array<i64: 8, 256>}]} {
    %c0 = arith.constant 0 : index
    %c0_0 = arith.constant 0 : index
    %0 = vector.load %arg1[%c0, %c0_0] : memref<8x32xf32, #tpu.memory_space<vmem>>, vector<8x32xf32>
    %1 = arith.truncf %0 : vector<8x32xf32> to vector<8x32xbf16>
    %c0_1 = arith.constant 0 : index
    %c0_2 = arith.constant 0 : index
    %2 = vector.load %arg2[%c0_1, %c0_2] : memref<32x256xbf16, #tpu.memory_space<vmem>>, vector<32x256xbf16>
    %cst = arith.constant dense<0.000000e+00> : vector<8x256xf32>
    %3 = tpu.matmul %1, %2, %cst {dimension_numbers = #tpu.dot_dimension_numbers<[1], [0], [0], [1], [0, 0, 1, 1], [], []>} : vector<8x32xbf16>, vector<32x256xbf16>, vector<8x256xf32> -> vector<8x256xf32>
    %c0_3 = arith.constant 0 : index
    %c0_4 = arith.constant 0 : index
    %4 = vector.load %arg3[%c0_3, %c0_4] : memref<1x256xf32, #tpu.memory_space<vmem>>, vector<1x256xf32>
    %5 = vector.broadcast %4 : vector<1x256xf32> to vector<8x256xf32>
    %6 = arith.addf %3, %5 : vector<8x256xf32>
    %cst_5 = arith.constant 0.000000e+00 : f32
    %7 = vector.broadcast %cst_5 : f32 to vector<8x256xf32>
    %8 = arith.maximumf %6, %7 : vector<8x256xf32>
    %9 = arith.truncf %8 : vector<8x256xf32> to vector<8x256xbf16>
    %c0_6 = arith.constant 0 : index
    %c0_7 = arith.constant 0 : index
    %10 = vector.load %arg4[%c0_6, %c0_7] : memref<256x128xbf16, #tpu.memory_space<vmem>>, vector<256x128xbf16>
    %cst_8 = arith.constant dense<0.000000e+00> : vector<8x128xf32>
    %11 = tpu.matmul %9, %10, %cst_8 {dimension_numbers = #tpu.dot_dimension_numbers<[1], [0], [0], [1], [0, 0, 1, 1], [], []>} : vector<8x256xbf16>, vector<256x128xbf16>, vector<8x128xf32> -> vector<8x128xf32>
    %c0_9 = arith.constant 0 : index
    %c0_10 = arith.constant 0 : index
    %12 = vector.load %arg5[%c0_9, %c0_10] : memref<1x128xf32, #tpu.memory_space<vmem>>, vector<1x128xf32>
    %13 = vector.broadcast %12 : vector<1x128xf32> to vector<8x128xf32>
    %14 = arith.addf %11, %13 : vector<8x128xf32>
    %cst_11 = arith.constant 0.000000e+00 : f32
    %15 = vector.broadcast %cst_11 : f32 to vector<8x128xf32>
    %16 = arith.maximumf %14, %15 : vector<8x128xf32>
    %17 = arith.truncf %16 : vector<8x128xf32> to vector<8x128xbf16>
    %c0_12 = arith.constant 0 : index
    %c0_13 = arith.constant 0 : index
    %18 = vector.load %arg6[%c0_12, %c0_13] : memref<128x256xbf16, #tpu.memory_space<vmem>>, vector<128x256xbf16>
    %cst_14 = arith.constant dense<0.000000e+00> : vector<8x256xf32>
    %19 = tpu.matmul %17, %18, %cst_14 {dimension_numbers = #tpu.dot_dimension_numbers<[1], [0], [0], [1], [0, 0, 1, 1], [], []>} : vector<8x128xbf16>, vector<128x256xbf16>, vector<8x256xf32> -> vector<8x256xf32>
    %c0_15 = arith.constant 0 : index
    %c0_16 = arith.constant 0 : index
    %20 = vector.load %arg7[%c0_15, %c0_16] : memref<1x256xf32, #tpu.memory_space<vmem>>, vector<1x256xf32>
    %21 = vector.broadcast %20 : vector<1x256xf32> to vector<8x256xf32>
    %22 = arith.addf %19, %21 : vector<8x256xf32>
    %c0_17 = arith.constant 0 : index
    %c0_18 = arith.constant 0 : index
    %23 = vector.load %arg8[%c0_17, %c0_18] : memref<8x256xf32, #tpu.memory_space<vmem>>, vector<8x256xf32>
    tpu.vector_store %arg8[%c0_17, %c0_18], %22 {strides = array<i32>} : memref<8x256xf32, #tpu.memory_space<vmem>>, vector<8x256xf32>,
    return
  }
  func.func @transform_0(%arg0: i32) -> (i32, i32) {
    %c0_i32 = arith.constant 0 : i32
    %c0_i32_0 = arith.constant 0 : i32
    return %arg0, %c0_i32 : i32, i32
  }
  func.func @transform_1(%arg0: i32) -> (i32, i32) {
    %c0_i32 = arith.constant 0 : i32
    %c0_i32_0 = arith.constant 0 : i32
    %c0_i32_1 = arith.constant 0 : i32
    return %c0_i32, %c0_i32_0 : i32, i32
  }
  func.func @transform_2(%arg0: i32) -> (i32, i32) {
    %c0_i32 = arith.constant 0 : i32
    %c0_i32_0 = arith.constant 0 : i32
    %c0_i32_1 = arith.constant 0 : i32
    return %c0_i32, %c0_i32_0 : i32, i32
  }
  func.func @transform_3(%arg0: i32) -> (i32, i32) {
    %c0_i32 = arith.constant 0 : i32
    %c0_i32_0 = arith.constant 0 : i32
    %c0_i32_1 = arith.constant 0 : i32
    return %c0_i32, %c0_i32_0 : i32, i32
  }
  func.func @transform_4(%arg0: i32) -> (i32, i32) {
    %c0_i32 = arith.constant 0 : i32
    %c0_i32_0 = arith.constant 0 : i32
    %c0_i32_1 = arith.constant 0 : i32
    return %c0_i32, %c0_i32_0 : i32, i32
  }
  func.func @transform_5(%arg0: i32) -> (i32, i32) {
    %c0_i32 = arith.constant 0 : i32
    %c0_i32_0 = arith.constant 0 : i32
    %c0_i32_1 = arith.constant 0 : i32
    return %c0_i32, %c0_i32_0 : i32, i32
  }
  func.func @transform_6(%arg0: i32) -> (i32, i32) {
    %c0_i32 = arith.constant 0 : i32
    %c0_i32_0 = arith.constant 0 : i32
    %c0_i32_1 = arith.constant 0 : i32
    return %c0_i32, %c0_i32_0 : i32, i32
  }
  func.func @transform_7(%arg0: i32) -> (i32, i32) {
    %c0_i32 = arith.constant 0 : i32
    %c0_i32_0 = arith.constant 0 : i32
    return %arg0, %c0_i32 : i32, i32
  }
}

</mosaic_0001>

<bundles_post_ra>
// kernel: autoencoder_forward.1
= control target key start
LH: loop header
LB: loop body
LE: loop exit
PB: predicated region body
PF: predicated region fallthrough
CT: control target
= control target key end

     0   :  { %12 = vsyncpa [#allocation3], 0  ;;  %s1467_s0 = inlined_call_operand.hbm [shape: f32[16,32], index: 0, kind: input, shape index: {}]   ;;  %s1468_s1 = inlined_call_operand.hbm [shape: bf16[32,256], index: 1, kind: input, shape index: {}]   ;;  %s1469_s2 = inlined_call_operand.vmem [shape: f32[1,256], index: 2, kind: input, shape index: {}]   ;;  %s1470_s3 = inlined_call_operand.hbm [shape: bf16[256,128], index: 3, kind: input, shape index: {}]   ;;  %s1471_s4 = inlined_call_operand.vmem [shape: f32[1,128], index: 4, kind: input, shape index: {}]   ;;  %s1472_s5 = inlined_call_operand.hbm [shape: bf16[128,256], index: 5, kind: input, shape index: {}]   ;;  %s1473_s6 = inlined_call_operand.vmem [shape: f32[1,256], index: 6, kind: input, shape index: {}]   ;;  %s1474_s7 = inlined_call_operand.vmem [shape: f32[16,256], index: 7, kind: output, shape index: {}]  }
   0x1   :  { %14 = vsyncpa [#allocation3 + $0x1], 0 }
   0x2   :  { %15 = vsyncpa [#allocation5], 0 }
   0x3   :  { %16 = vsyncpa [#allocation8], 0  ;;  %s1258_s24 = smov 0   ;;  %s1260_s25 = smov 0  }
   0x4   :  { %s1262_s26 = smov 0   ;;  %s1264_s27 = smov 0  }
   0x5 LB: > { %s1277_s28 = sadd.s32 4294967295, %s1207_s27   ;;  %p42_p0 = scmp.ne.s32.totalorder %s1199_s25, %s1195_s24  ;;  %s1207_s27 = sphi %s1264_s27, %s1496_s27   ;;  %s1203_s26 = sphi %s1262_s26, %s1495_s26   ;;  %s1199_s25 = sphi %s1260_s25, %s1494_s25   ;;  %s1195_s24 = sphi %s1258_s24, %s1493_s24  }
   0x6   : > { %p1475_p1 = scmp.eq.s32.totalorder %s1277_s28, 0  ;;  %p853_p2 = scmp.ge.s32.totalorder %s1207_s27, 1 }
   0x7   : > { %p205_p3 = scmp.lt.s32.totalorder %s1207_s27, 3  ;;  %s1209_s8 = smov [#allocation4]  }
   0x8   : > { %p1285_p4 = por %p1475_p1, %p42_p0  ;;  %s217_s9 = sshll.u32 %s1209_s8, 4  ;;  %s218_s9 = int_to_ptr.vmem [resolvable:$true] %s217_s9 }
   0x9   : > { %p1289_p5 = pnand %p853_p2, %p205_p3  ;;  %s1210_s11 = smov [#allocation6]  }
   0xa   : > { %s1480_s29 = scalar_select %p1285_p4, 1, 0 }
   0xb   : > { %s1481_s30 = scalar_select %p1289_p5, 1, 0 }
   0xc   : > { %p944_p6 = pneg %p1289_p5  ;;  %s233_s12 = sshll.u32 %s1210_s11, 4  ;;  %s1301_s12 = int_to_ptr.vmem [resolvable:$true] %s233_s12 }
   0xd   : > { %s1051_s15 = scalar_lea.hbm %s1468_s1, 512 }
   0xe   : > { %p1297_p7 = pnand %p944_p6, %p1475_p1  ;;  %p1052_p8 = scmp.ne.s32.totalorder %s1468_s1, %s1051_s15 }
   0xf   : > { %p1058_p12 = scmp.lt.u32.totalorder %s1051_s15, %s1468_s1 }
  0x10   : > { %p1311_p9 = pneg %p1297_p7 }
  0x12   : > { %p1054_p10 = pnand %p1311_p9, %p1052_p8 }
  0x14   : > { %p1055_p11 = pneg %p1054_p10 }
  0x16   : > { %p1060_p13 = pnand %p1058_p12, %p1055_p11 }
  0x18   : > { %1063 = shalt.err (!%p1060_p13)
}
  0x19   : > { %s1064_s21 = scalar_lea.vmem %s218_s9, 512  ;;  %p1072_p6 = scmp.lt.s32.totalorder %s218_s9, %s218_s9 }
  0x1a   : > { %p1065_p0 = scmp.ne.s32.totalorder %s218_s9, %s1064_s21  ;;  %p1073_p1 = scmp.lt.s32.totalorder %s1064_s21, %s1064_s21 }
  0x1c   : > { %p1067_p2 = pnand %p1065_p0, %p1311_p9  ;;  %p1074_p4 = por %p1073_p1, %p1072_p6 }
  0x1e   : > { %p1068_p3 = pneg %p1067_p2 }
  0x20   : > { %p1075_p5 = pnand %p1074_p4, %p1068_p3 }
  0x22   : > { %1078 = shalt.err (!%p1075_p5)
}
  0x23   : > { %s1478_s22 = smov 128   ;;  %s1479_s23 = smov 8  }
  0x24   : > { %947 = dma.hbm_to_vmem [thread:$0]  (!%p1297_p7), %s1468_s1, 512, %s218_s9, [#allocation5], %s1478_s22, %s1478_s22, %s1479_s23  }
  0x25   : > { %s1079_s14 = scalar_lea.hbm %s1470_s3, 2048 }
  0x26   : > { %p1080_p1 = scmp.ne.s32.totalorder %s1470_s3, %s1079_s14  ;;  %p1086_p8 = scmp.lt.u32.totalorder %s1079_s14, %s1470_s3 }
  0x28   : > { %p1082_p4 = pnand %p1080_p1, %p1311_p9 }
  0x2a   : > { %p1083_p5 = pneg %p1082_p4 }
  0x2c   : > { %p1088_p10 = pnand %p1086_p8, %p1083_p5 }
  0x2e   : > { %1091 = shalt.err (!%p1088_p10)
}
  0x2f   : > { %s1092_s9 = scalar_lea.vmem %s1301_s12, 2048  ;;  %p1100_p0 = scmp.lt.s32.totalorder %s1301_s12, %s1301_s12 }
  0x30   : > { %p1093_p11 = scmp.ne.s32.totalorder %s1301_s12, %s1092_s9  ;;  %p1101_p2 = scmp.lt.s32.totalorder %s1092_s9, %s1092_s9 }
  0x32   : > { %p1095_p12 = pnand %p1093_p11, %p1311_p9  ;;  %p1102_p3 = por %p1101_p2, %p1100_p0 }
  0x34   : > { %p1096_p13 = pneg %p1095_p12 }
  0x36   : > { %p1103_p6 = pnand %p1102_p3, %p1096_p13 }
  0x38   : > { %1106 = shalt.err (!%p1103_p6)
}
  0x39   : > { %s1213_s20 = smov 64   ;;  %s1214_s21 = smov 4  }
  0x3a   : > { %950 = dma.hbm_to_vmem [thread:$0]  (!%p1297_p7), %s1470_s3, 2048, %s1301_s12, [#allocation5], %s1213_s20, %s1213_s20, %s1214_s21  }
  0x3b   : > { %s1215_s11 = smov [#allocation7]   ;;  %s1354_s14 = sadd.s32 1, %s1207_s27  }
  0x3c   : > { %s249_s13 = sshll.u32 %s1215_s11, 4  ;;  %s1107_s17 = scalar_lea.hbm %s1472_s5, 2048  ;;  %s250_s13 = int_to_ptr.vmem [resolvable:$true] %s249_s13 }
  0x3d   : > { %p1108_p1 = scmp.ne.s32.totalorder %s1472_s5, %s1107_s17  ;;  %p1114_p8 = scmp.lt.u32.totalorder %s1107_s17, %s1472_s5 }
  0x3f   : > { %p1110_p4 = pnand %p1108_p1, %p1311_p9 }
  0x41   : > { %p1111_p5 = pneg %p1110_p4 }
  0x43   : > { %p1116_p10 = pnand %p1114_p8, %p1111_p5 }
  0x45   : > { %1119 = shalt.err (!%p1116_p10)
}
  0x46   : > { %s1120_s12 = scalar_lea.vmem %s250_s13, 2048  ;;  %p1128_p0 = scmp.lt.s32.totalorder %s250_s13, %s250_s13 }
  0x47   : > { %p1121_p11 = scmp.ne.s32.totalorder %s250_s13, %s1120_s12  ;;  %p1129_p2 = scmp.lt.s32.totalorder %s1120_s12, %s1120_s12 }
  0x49   : > { %p1123_p12 = pnand %p1121_p11, %p1311_p9  ;;  %p1130_p3 = por %p1129_p2, %p1128_p0 }
  0x4b   : > { %p1124_p13 = pneg %p1123_p12 }
  0x4d   : > { %p1131_p6 = pnand %p1130_p3, %p1124_p13 }
  0x4f   : > { %1134 = shalt.err (!%p1131_p6)
}
  0x50   : > { %s1484_s20 = smov 8   ;;  %s1485_s21 = smov 128  }
  0x51   : > { %953 = dma.hbm_to_vmem [thread:$0]  (!%p1297_p7), %s1472_s5, 2048, %s250_s13, [#allocation8], %s1485_s21, %s1485_s21, %s1484_s20  }
  0x52   : > { %s26_s18 = ssub.s32 %s1207_s27, %s1354_s14  ;;  %s29_s24 = sadd.s32 1, %s1203_s26 }
  0x53   : > { %p27_p9 = scmp.eq.s32.totalorder %s26_s18, 0  ;;  %p36_p1 = scmp.ne.s32.totalorder %s1203_s26, %s1199_s25 }
  0x54   : > { %p37_p4 = scmp.eq.s32.totalorder %s1207_s27, 0  ;;  %p961_p5 = scmp.lt.s32.totalorder %s1207_s27, 2 }
  0x55   : > { %s1385_s10 = scalar_select %p27_p9, %s1203_s26, %s29_s24  }
  0x56   : > { %p38_p8 = por %p37_p4, %p36_p1  ;;  %s266_s8 = sand.u32 1, %s1203_s26  }
  0x57   : > { %s858_s11 = sshll.u32 %s266_s8, 3  ;;  %s859_s15 = sshll.u32 %s1207_s27, 7 }
  0x58   : > { %s1392_s19 = scalar_lea.hbm %s1467_s0, %s859_s15  ;;  %s270_s13 = scalar_lea.vmem [#allocation2], %s858_s11 }
  0x59   : > { %s277_s9 = sshll.u32 %s270_s13, 4  ;;  %p1396_p7 = pnand %p961_p5, %p38_p8  ;;  %s1394_s9 = int_to_ptr.vmem [resolvable:$true] %s277_s9 }
  0x5a   : > { %s267_s27 = scalar_lea.sflag [#allocation3], %s266_s8  ;;  %s1135_s20 = scalar_lea.hbm %s1392_s19, 128 }
  0x5b   : > { %p1136_p10 = scmp.ne.s32.totalorder %s1392_s19, %s1135_s20  ;;  %p1137_p11 = pneg %p1396_p7 }
  0x5c   : > { %s1140_s23 = scalar_lea.hbm %s1467_s0, 256  ;;  %p1141_p0 = scmp.lt.u32.totalorder %s1392_s19, %s1467_s0 }
  0x5d   : > { %p1138_p12 = pnand %p1137_p11, %p1136_p10  ;;  %p1142_p2 = scmp.lt.u32.totalorder %s1140_s23, %s1135_s20 }
  0x5e   : > { %p1144_p6 = scmp.lt.u32.totalorder %s1135_s20, %s1392_s19 }
  0x5f   : > { %p1139_p13 = pneg %p1138_p12  ;;  %p1143_p3 = por %p1142_p2, %p1141_p0 }
  0x61   : > { %p1145_p9 = por %p1144_p6, %p1143_p3 }
  0x63   : > { %p1146_p1 = pnand %p1145_p9, %p1139_p13 }
  0x65   : > { %1149 = shalt.err (!%p1146_p1)
}
  0x66   : > { %s1150_s8 = scalar_lea.vmem %s1394_s9, 128  ;;  %s1216_s11 = smov [#allocation2]  }
  0x67   : > { %p1151_p4 = scmp.ne.s32.totalorder %s1394_s9, %s1150_s8  ;;  %s1155_s15 = sshll.u32 %s1216_s11, 4  ;;  %s1156_s15 = int_to_ptr.vmem [resolvable:$false] %s1155_s15 }
  0x68   : > { %s1157_s16 = scalar_lea.vmem %s1156_s15, 256  ;;  %p1158_p10 = scmp.lt.s32.totalorder %s1394_s9, %s1156_s15 }
  0x69   : > { %p1153_p5 = pnand %p1151_p4, %p1137_p11  ;;  %p1159_p12 = scmp.lt.s32.totalorder %s1157_s16, %s1150_s8 }
  0x6b   : > { %p1154_p8 = pneg %p1153_p5  ;;  %p1160_p0 = por %p1159_p12, %p1158_p10 }
  0x6d   : > { %p1161_p2 = pnand %p1160_p0, %p1154_p8 }
  0x6f   : > { %1164 = shalt.err (!%p1161_p2)
}
  0x70   : > { %957 = dma.hbm_to_vmem [thread:$0]  (!%p1396_p7), %s1392_s19, 128, %s1394_s9, %s267_s27  }
  0x71   : > { %p1487_p13 = scmp.ne.s32.totalorder %s1481_s30, 0 }
  0x72   : > { %s288_s17 = sand.u32 (!%p1487_p13), 1, %s1199_s25   ;;  %p1488_p11 = scmp.ne.s32.totalorder (!%p1487_p13), %s1480_s29, 0 }
  0x73   : > { %286 = sbr.rel (%p1487_p13) target bundleno = 795 (0x31b), region = 48  ;;  %s861_s13 = sshll.u32 (!%p1487_p13), %s288_s17, 3 }
  0x74   : > { %s289_s20 = scalar_lea.sflag (!%p1487_p13), [#allocation3], %s288_s17  ;;  %s292_s21 = scalar_lea.vmem (!%p1487_p13), [#allocation2], %s861_s13 }
  0x7a   : > { %1182 = dma.done.wait (%p1488_p11), %s289_s20, 128  }
  0x7b   : > { %1184 = vsyncadd (%p1488_p11), %s289_s20, 4294967168  ;;  %p1489_p3 = scmp.eq.s32.totalorder %s1277_s28, 0 }
  0x7d   : > { %1186 = dma.done.wait (%p1489_p3), [#allocation5], 2560   ;;  %p1490_p6 = pmov %p1489_p3 }
  0x7e   : > { %p1491_p7 = pmov %p1489_p3 }
  0x7f   : > { %1188 = vsyncadd (%p1490_p6), [#allocation5], 4294964736 }
  0x80   : > { %1190 = dma.done.wait (%p1491_p7), [#allocation8], 2048   ;;  %p1492_p9 = pmov %p1489_p3 }
  0x81   : > { %v1217_v0 = vmov 0   ;;  %v1005_v1 = vld [vmem:[#allocation4 + $0x4] ss:$8 sps:$4 sm:$0xff]   ;;  %v1007_v2 = vld [vmem:[#allocation4] ss:$8 sps:$4 sm:$0xff]   ;;  %v341_v5 = vld [vmem:[%s292_s21] sm:$0xff]  ;;  %v349_v35 = vlaneseq }
  0x82   : > { %1192 = vsyncadd (%p1492_p9), [#allocation8], 4294965248  ;;  %415 = vmatprep.mubr.bf16.mxu0 %v1217_v0  ;;  %383 = vmatprep.subr.bf16.mxu0 %v1005_v1  ;;  %v1008_v3 = vld [vmem:[#allocation4 + $0x14] ss:$8 sps:$4 sm:$0xff]   ;;  %v1010_v4 = vld [vmem:[#allocation4 + $0x10] ss:$8 sps:$4 sm:$0xff]   ;;  %v342_v9 = vpack.c.bf16 %v341_v5, %v341_v5 }
  0x83   : > { %384 = vmatpush1.bf16.msra.mxu0 %v1007_v2  ;;  %v1011_v6 = vld [vmem:[#allocation6 + $0x40] sm:$0xff]   ;;  %v1013_v8 = vld [vmem:[#allocation6 + $0x48] sm:$0xff]   ;;  %vm379_vm0 = vcmask 261120   ;;  %v1015_v11 = vld [vmem:[#allocation6 + $0x50] sm:$0xff]   ;;  %v350_v36 = vshrl.u32 %v349_v35, 7  ;;  %p335_p1 = scmp.lt.s32.totalorder %s1277_s28, 1 }
  0x84   : > { %385 = vmatprep.subr.bf16.mxu0 %v1008_v3  ;;  %v1012_v7 = vld [vmem:[#allocation6] sm:$0xff]   ;;  %908 = vmatprep.subr.bf16.mxu1 %v1011_v6  ;;  %v1014_v10 = vld [vmem:[#allocation6 + $0x8] sm:$0xff]   ;;  %v1016_v12 = vld [vmem:[#allocation6 + $0x10] sm:$0xff]  }
  0x85   : > { %909 = vmatpush3.bf16.msra.mxu1 %v1012_v7  ;;  %v1017_v13 = vld [vmem:[#allocation6 + $0x58] sm:$0xff]   ;;  %v1019_v15 = vld [vmem:[#allocation6 + $0x60] sm:$0xff]   ;;  %v1021_v17 = vld [vmem:[#allocation6 + $0x68] sm:$0xff]   ;;  %v351_v37 = vsub.s32 0, %v350_v36  ;;  %v355_v39 = vsub.s32 1, %v350_v36  ;;  %s1498_s28 = smov (!%p335_p1, %s1277_s28), 1 }
  0x86   : > { %910 = vmatprep.subr.bf16.mxu1 %v1013_v8  ;;  %v1018_v14 = vld [vmem:[#allocation6 + $0x18] sm:$0xff]   ;;  %v1020_v16 = vld [vmem:[#allocation6 + $0x20] sm:$0xff]   ;;  %v1022_v18 = vld [vmem:[#allocation6 + $0x28] sm:$0xff]   ;;  %s907_s22 = sshll.u32 %s1498_s28, 4 }
  0x87   : > { %386 = vmatpush1.bf16.msra.mxu0 %v1010_v4  ;;  %v1023_v19 = vld [vmem:[#allocation6 + $0x70] sm:$0xff]   ;;  %v1025_v21 = vld [vmem:[#allocation6 + $0x78] sm:$0xff]   ;;  %v1027_v23 = vld [vmem:[#allocation7] ss:$8 sps:$4 sm:$0xff]   ;;  %s339_s24 = scalar_lea.vmem %s1474_s7, %s907_s22 }
  0x88   : > { %v1024_v20 = vld [vmem:[#allocation6 + $0x30] sm:$0xff]   ;;  %v1026_v22 = vld [vmem:[#allocation6 + $0x38] sm:$0xff]   ;;  %v1029_v24 = vld [vmem:[#allocation7 + $0x4] ss:$8 sps:$4 sm:$0xff]  }
  0x89   : > { %911 = vmatpush3.bf16.msra.mxu1 %v1014_v10  ;;  %v1032_v25 = vld [vmem:[#allocation7 + $0x14] ss:$8 sps:$4 sm:$0xff]   ;;  %713 = vmatprep.subr.bf16.mxu0 %v1029_v24  ;;  %v1030_v26 = vld [vmem:[#allocation7 + $0x10] ss:$8 sps:$4 sm:$0xff]   ;;  %v1035_v27 = vld [vmem:[#allocation7 + $0x24] ss:$8 sps:$4 sm:$0xff]  }
  0x8a   : > { %871 = vmatmul.mubr.msk.bf16.vlgmr.msra.gmra.mrb[0].mxu0 %vm379_vm0, %v342_v9  ;;  %912 = vmatprep.subr.bf16.mxu1 %v1015_v11  ;;  %v1033_v28 = vld [vmem:[#allocation7 + $0x20] ss:$8 sps:$4 sm:$0xff]   ;;  %v1038_v29 = vld [vmem:[#allocation7 + $0x34] ss:$8 sps:$4 sm:$0xff]   ;;  %v1036_v30 = vld [vmem:[#allocation7 + $0x30] ss:$8 sps:$4 sm:$0xff]  }
  0x8b   : > { %745 = vmatprep.mubr.bf16.mxu0 %v1217_v0  ;;  %714 = vmatpush1.bf16.msra.mxu0 %v1027_v23  ;;  %v1041_v31 = vld [vmem:[#allocation7 + $0x44] ss:$8 sps:$4 sm:$0xff]   ;;  %v1039_v32 = vld [vmem:[#allocation7 + $0x40] ss:$8 sps:$4 sm:$0xff]   ;;  %v1044_v33 = vld [vmem:[#allocation7 + $0x54] ss:$8 sps:$4 sm:$0xff]  }
  0x8c   : > { %715 = vmatprep.subr.bf16.mxu0 %v1032_v25  ;;  %v1042_v34 = vld [vmem:[#allocation7 + $0x50] ss:$8 sps:$4 sm:$0xff]   ;;  %v1047_v52 = vld [vmem:[#allocation7 + $0x64] ss:$8 sps:$4 sm:$0xff]   ;;  %v1045_v53 = vld [vmem:[#allocation7 + $0x60] ss:$8 sps:$4 sm:$0xff]  }
  0x8d   : > { %913 = vmatpush3.bf16.msra.mxu1 %v1016_v12  ;;  %v347_v38 = vld [vmem:[%s1469_s2] sm:$0x3]  ;;  %v1050_v54 = vld [vmem:[#allocation7 + $0x74] ss:$8 sps:$4 sm:$0xff]  }
  0x8e   : > { %914 = vmatprep.subr.bf16.mxu1 %v1017_v13  ;;  %v352_v40 = vrot.slane %v347_v38, %v351_v37  ;;  %v356_v41 = vrot.slane %v347_v38, %v355_v39  ;;  %v1048_v55 = vld [vmem:[#allocation7 + $0x70] ss:$8 sps:$4 sm:$0xff]  }
  0x8f   : > { %716 = vmatpush1.bf16.msra.mxu0 %v1030_v26  ;;  %v872_v57 = vld [vmem:[%s1471_s4] ss:$0 sm:$0xff] }
  0x90   : > { %717 = vmatprep.subr.bf16.mxu0 %v1035_v27  ;;  %v621_v1 = vld [vmem:[%s1473_s6] sm:$0x3] }
  0x91   : > { %915 = vmatpush3.bf16.msra.mxu1 %v1018_v14  ;;  %v626_v2 = vrot.slane %v621_v1, %v351_v37  ;;  %v630_v3 = vrot.slane %v621_v1, %v355_v39 }
  0x92   : > { %916 = vmatprep.subr.bf16.mxu1 %v1019_v15 }
  0x93   : > { %718 = vmatpush1.bf16.msra.mxu0 %v1033_v28 }
  0x94   : > { %719 = vmatprep.subr.bf16.mxu0 %v1038_v29 }
  0x95   : > { %917 = vmatpush3.bf16.msra.mxu1 %v1020_v16 }
  0x96   : > { %918 = vmatprep.subr.bf16.mxu1 %v1021_v17 }
  0x97   : > { %720 = vmatpush1.bf16.msra.mxu0 %v1036_v30 }
  0x98   : > { %721 = vmatprep.subr.bf16.mxu0 %v1041_v31 }
  0x99   : > { %919 = vmatpush3.bf16.msra.mxu1 %v1022_v18 }
  0x9a   : > { %920 = vmatprep.subr.bf16.mxu1 %v1023_v19 }
  0x9b   : > { %722 = vmatpush1.bf16.msra.mxu0 %v1039_v32 }
  0x9c   : > { %723 = vmatprep.subr.bf16.mxu0 %v1044_v33 }
  0x9d   : > { %921 = vmatpush3.bf16.msra.mxu1 %v1024_v20 }
  0x9e   : > { %922 = vmatprep.subr.bf16.mxu1 %v1025_v21 }
  0x9f   : > { %724 = vmatpush1.bf16.msra.mxu0 %v1042_v34 }
  0xa0   : > { %725 = vmatprep.subr.bf16.mxu0 %v1047_v52 }
  0xa1   : > { %923 = vmatpush3.bf16.msra.mxu1 %v1026_v22 }
  0xa3   : > { %726 = vmatpush1.bf16.msra.mxu0 %v1045_v53 }
  0xa4   : > { %727 = vmatprep.subr.bf16.mxu0 %v1050_v54 }
  0xa7   : > { %728 = vmatpush1.bf16.msra.mxu0 %v1048_v55 }
 0x15d   : > { %v417_v42 = vpop.f32.mrb[0].mxu0 }
 0x15e   : > { %v418_v43 = vadd.f32 %v417_v42, %v352_v40  ;;  %v419_v44 = vpop.f32.mrb[1].mxu0 }
 0x15f   : > { %v420_v45 = vadd.f32 %v419_v44, %v356_v41  ;;  %v421_v46 = vpop.f32.mrb[2].mxu0 }
 0x160   : > { %v424_v47 = vmax.f32 %v418_v43, 0.0  ;;  %v422_v48 = vpop.f32.mrb[3].mxu0 }
 0x161   : > { %v425_v49 = vmax.f32 %v420_v45, 0.0 }
 0x162   : > { %v426_v51 = vpack.c.bf16 %v424_v47, %v424_v47 }
 0x163   : > { %v427_v50 = vpack.c.bf16 %v425_v49, %v425_v49 }
 0x165   : > { %595 = vmatprep.mubr.bf16.mxu1 %v427_v50 }
 0x166   : > { %596 = vmatmul.mubr.bf16.vlgmr.msra.gmra.mrb[0].mxu1 %v426_v51 }
 0x239   : > { %v924_v56 = vpop.f32.mrb[0].mxu1 }
 0x23a   : > { %v925_v58 = vpop.f32.mrb[1].mxu1 }
 0x23b   : > { %v926_v59 = vadd.f32 %v925_v58, %v924_v56  ;;  %v927_v60 = vpop.f32.mrb[2].mxu1 }
 0x23c   : > { %v928_v61 = vpop.f32.mrb[3].mxu1 }
 0x23d   : > { %v598_v62 = vadd.f32 %v926_v59, %v872_v57 }
 0x23f   : > { %v603_v63 = vmax.f32 %v598_v62, 0.0 }
 0x241   : > { %v604_v0 = vpack.c.bf16 %v603_v63, %v603_v63 }
 0x243   : > { %746 = vmatmul.mubr.bf16.vlgmr.msra.gmra.mrb[4].mxu0 %v604_v0 }
 0x316   : > { %v747_v4 = vpop.f32.mrb[4].mxu0 }
 0x317   : > { %v748_v5 = vadd.f32 %v747_v4, %v626_v2  ;;  %v749_v6 = vpop.f32.mrb[5].mxu0 }
 0x318   : > { %v750_v7 = vadd.f32 %v749_v6, %v630_v3  ;;  %v751_v8 = vpop.f32.mrb[6].mxu0 }
 0x319   : > { %754 = vst [vmem:[%s339_s24] sm:$0xff] %v748_v5  ;;  %v752_v9 = vpop.f32.mrb[7].mxu0 }
 0x31a   : > { %755 = vst [vmem:[%s339_s24 + $0x8] sm:$0xff] %v750_v7 }
 0x31b PF: > { %p19_p4 = scmp.ge.s32.totalorder %s1354_s14, 4   ;;  %s1493_s24 = smov %s1199_s25 }
 0x31c   : > { %s1494_s25 = smov %s1203_s26  ;;  %s1495_s26 = smov %s1385_s10 }
 0x31d   : > { %s1496_s27 = smov %s1354_s14  ;;  %21 = sbr.rel (!%p19_p4) target bundleno = 5 (0x5), region = 100 }
 0x324   :  { %777 = vsyncpa [#allocation3], 1 }
 0x325   :  { %779 = vsyncpa [#allocation3 + $0x1], 1 }
 0x326   :  { %780 = vsyncpa [#allocation5], 1 }
 0x327   :  { %781 = vsyncpa [#allocation8], 1 }

</bundles_post_ra>
